<compile_context>
chip_gen: v6e
topology: v6e:2x2x1
jax: 0.10.0
libtpu: 0.0.40
codegen_flags: <defaults>
</compile_context>

<pallas_src>
import functools

import jax
import jax.numpy as jnp
from jax.experimental import pallas as pl
from jax.experimental.pallas import tpu as pltpu


# ---------------------------------------------------------------------------
# Kernel 1: stats-only pass.  Computes y = W @ x_tile on the fly and reduces
# to per-channel sum / sum-of-squares partials for this grid step.
# ---------------------------------------------------------------------------
def conv_stats_kernel(x_ref, w_ref, sum_ref, sq_ref):
    x = x_ref[0]                                     # (C_in, t_hw)
    y = jnp.dot(w_ref[...], x,                       # (C_out, t_hw), f32 acc
                preferred_element_type=jnp.float32)
    part_sum = jnp.sum(y, axis=1, keepdims=True)     # (C_out, 1)
    part_sq = jnp.sum(y * y, axis=1, keepdims=True)  # (C_out, 1)
    sum_ref[...] = part_sum[None, None]              # (1, 1, C_out, 1)
    sq_ref[...] = part_sq[None, None]


# ---------------------------------------------------------------------------
# Kernel 2: fused 1x1 conv (recomputed) + BN affine (precomputed scale/shift)
# + ReLU, lane-dense NCHW output.
# ---------------------------------------------------------------------------
def conv_bn_relu_kernel(x_ref, w_ref, scale_ref, shift_ref, o_ref):
    x = x_ref[0]                                     # (C_in, t_hw)
    y = jnp.dot(w_ref[...], x,                       # (C_out, t_hw), f32 acc
                preferred_element_type=jnp.float32)
    y = y * scale_ref[...] + shift_ref[...]          # (C_out,1) broadcast on lanes
    o_ref[0] = jnp.maximum(y, 0.0).astype(o_ref.dtype)


# ---------------------------------------------------------------------------
# Lane-tile chooser: biggest tile over H*W that fits a conservative VMEM
# budget (safe across v5e/v6e/v7x) and divides H*W (or equals it).
# ---------------------------------------------------------------------------
def _pick_tile_hw(hw, c_in, c_out):
    # Per-grid-step VMEM (pass 2): double-buffered x + out tiles + f32 y temp.
    bytes_per_lane = 4 * (2 * c_in + 3 * c_out)
    vmem_cap = 24 * 1024 * 1024        # leave headroom under v7x's 64 MiB VMEM
    max_t = max(128, (vmem_cap // bytes_per_lane) // 128 * 128)
    if hw <= max_t:
        return hw                      # full row: block equals full array dim
    t = max_t
    while t >= 128:
        if hw % t == 0:
            return t
        t -= 128
    # TODO(synk): ragged H*W with no multiple-of-128 divisor would need a
    # padded/masked tail tile; fall back to the full row.
    return hw


# ---------------------------------------------------------------------------
# Wrapper: point_conv forward pass.
# ---------------------------------------------------------------------------
@functools.partial(jax.jit, static_argnames=("t_hw", "use_bf16"))
def point_conv_forward(x_nchw, w, gamma, beta, *, eps=1e-5, t_hw=None,
                       use_bf16=False):
    """x_nchw: (N, C_in, H, W) float32
       w:      (C_out, C_in)   float32  (1x1 conv weight, squeezed)
       gamma, beta: (C_out,)   float32  BatchNorm affine params
    """
    N, C_in, H, W = x_nchw.shape
    C_out = w.shape[0]
    HW = H * W
    M = N * HW

    if t_hw is None:
        t_hw = _pick_tile_hw(HW, C_in, C_out)
    assert HW % t_hw == 0, "H*W must be divisible by the lane tile t_hw"
    g_hw = HW // t_hw
    grid = (N, g_hw)

    # Free reshapes only (no transposes): NCHW -> (N, C_in, HW).
    mm_dtype = jnp.bfloat16 if use_bf16 else jnp.float32
    x3d = x_nchw.reshape(N, C_in, HW).astype(mm_dtype)
    w2d = w.astype(mm_dtype)                          # (C_out, C_in)

    compiler_params = pltpu.CompilerParams(
        dimension_semantics=("parallel", "parallel"),
        vmem_limit_bytes=48 * 1024 * 1024,
    )

    # --- pass 1: per-tile channel statistics (y never written to HBM) ---
    part_sum, part_sq = pl.pallas_call(
        conv_stats_kernel,
        out_shape=(
            jax.ShapeDtypeStruct((N, g_hw, C_out, 1), jnp.float32),
            jax.ShapeDtypeStruct((N, g_hw, C_out, 1), jnp.float32),
        ),
        grid_spec=pltpu.PrefetchScalarGridSpec(
            num_scalar_prefetch=0,
            grid=grid,
            in_specs=[
                pl.BlockSpec((1, C_in, t_hw), lambda n, j: (n, 0, j)),
                pl.BlockSpec((C_out, C_in), lambda n, j: (0, 0)),
            ],
            out_specs=[
                pl.BlockSpec((1, 1, C_out, 1), lambda n, j: (n, j, 0, 0)),
                pl.BlockSpec((1, 1, C_out, 1), lambda n, j: (n, j, 0, 0)),
            ],
        ),
        compiler_params=compiler_params,
    )(x3d, w2d)

    # --- tiny scalar glue: BN batch statistics (biased var, like PyTorch fwd) ---
    ch_sum = jnp.sum(part_sum, axis=(0, 1))[:, 0]     # (C_out,)
    ch_sq = jnp.sum(part_sq, axis=(0, 1))[:, 0]       # (C_out,)
    m = jnp.float32(M)
    mean = ch_sum / m
    # TODO(synk): E[y^2]-E[y]^2 can cancel catastrophically for huge M / large
    # activation means; clamp at 0 here, use a centered two-pass if it matters.
    var = jnp.maximum(ch_sq / m - mean * mean, 0.0)
    inv_std = jax.lax.rsqrt(var + eps)
    scale = (gamma * inv_std).astype(jnp.float32)[:, None]          # (C_out, 1)
    shift = (beta - mean * gamma * inv_std).astype(jnp.float32)[:, None]
    # TODO(synk): running_mean / running_var buffer updates are training-state
    # side effects and do not affect the forward output; not reproduced here.

    # --- pass 2: fused conv + BN affine + ReLU, lane-dense NCHW output ---
    out3d = pl.pallas_call(
        conv_bn_relu_kernel,
        out_shape=jax.ShapeDtypeStruct((N, C_out, HW), jnp.float32),
        grid_spec=pltpu.PrefetchScalarGridSpec(
            num_scalar_prefetch=0,
            grid=grid,
            in_specs=[
                pl.BlockSpec((1, C_in, t_hw), lambda n, j: (n, 0, j)),
                pl.BlockSpec((C_out, C_in), lambda n, j: (0, 0)),
                pl.BlockSpec((C_out, 1), lambda n, j: (0, 0)),
                pl.BlockSpec((C_out, 1), lambda n, j: (0, 0)),
            ],
            out_specs=pl.BlockSpec((1, C_out, t_hw), lambda n, j: (n, 0, j)),
        ),
        compiler_params=compiler_params,
    )(x3d, w2d, scale, shift)

    # Free reshape back to NCHW.
    return out3d.reshape(N, C_out, H, W)


# ---------------------------------------------------------------------------
# Pure-JAX reference for a sanity check.
# ---------------------------------------------------------------------------
def point_conv_ref(x_nchw, w, gamma, beta, eps=1e-5):
    y = jnp.einsum("nchw,oc->nohw", x_nchw, w)
    mean = jnp.mean(y, axis=(0, 2, 3), keepdims=True)
    var = jnp.mean((y - mean) ** 2, axis=(0, 2, 3), keepdims=True)
    y = (y - mean) * jax.lax.rsqrt(var + eps)
    y = y * gamma[None, :, None, None] + beta[None, :, None, None]
    return jnp.maximum(y, 0.0)


if __name__ == "__main__":
    # Small deterministic setup: in_dim=4, out_dim=8, input (2, 4, 16, 16)
    N, C_in, H, W = 2, 4, 16, 16
    C_out = 8

    key = jax.random.PRNGKey(0)
    kx, kw = jax.random.split(key)

    x = jax.random.normal(kx, (N, C_in, H, W), dtype=jnp.float32)

    # Conv2d(C_in, C_out, kernel_size=1, bias=False) weight: (C_out, C_in, 1, 1),
    # squeezed to (C_out, C_in).  Deterministic kaiming-uniform-ish init.
    bound = 1.0 / jnp.sqrt(jnp.float32(C_in))
    w = jax.random.uniform(kw, (C_out, C_in), dtype=jnp.float32,
                           minval=-bound, maxval=bound)

    # BatchNorm2d default init: weight=1, bias=0.
    gamma = jnp.ones((C_out,), dtype=jnp.float32)
    beta = jnp.zeros((C_out,), dtype=jnp.float32)

    out = point_conv_forward(x, w, gamma, beta)
    out = jax.block_until_ready(out)

    ref = point_conv_ref(x, w, gamma, beta)
    assert out.shape == (N, C_out, H, W)
    assert jnp.allclose(out, ref, atol=1e-4, rtol=1e-4), "mismatch vs reference"

    print("KERNEL_OK")
</pallas_src>

<mosaic_0001>
module attributes {stable_mosaic.version = 11 : i64} {
  func.func @conv_stats_kernel(%arg0: i32, %arg1: i32, %arg2: memref<1x4x256xf32, #tpu.memory_space<vmem>>, %arg3: memref<8x4xf32, #tpu.memory_space<vmem>>, %arg4: memref<1x1x8x1xf32, #tpu.memory_space<vmem>>, %arg5: memref<1x1x8x1xf32, #tpu.memory_space<vmem>>) attributes {dimension_semantics = [#tpu.dimension_semantics<parallel>, #tpu.dimension_semantics<parallel>], iteration_bounds = array<i64: 2, 1>, scalar_prefetch = 0 : i64, scratch_operands = 0 : i64, tpu.core_type = #tpu.core_type<tc>, window_params = [{transform_indices = @transform_0, window_bounds = array<i64: 1, 4, 256>}, {pipeline_mode = #tpu.pipeline_mode<synchronous>, transform_indices = @transform_1, window_bounds = array<i64: 8, 4>}, {transform_indices = @transform_2, window_bounds = array<i64: 1, 1, 8, 1>}, {transform_indices = @transform_3, window_bounds = array<i64: 1, 1, 8, 1>}]} {
    %c0 = arith.constant 0 : index
    %c0_0 = arith.constant 0 : index
    %c0_1 = arith.constant 0 : index
    %0 = vector.load %arg2[%c0, %c0_0, %c0_1] : memref<1x4x256xf32, #tpu.memory_space<vmem>>, vector<1x4x256xf32>
    %1 = vector.shape_cast %0 : vector<1x4x256xf32> to vector<4x256xf32>
    %c0_2 = arith.constant 0 : index
    %c0_3 = arith.constant 0 : index
    %2 = vector.load %arg3[%c0_2, %c0_3] : memref<8x4xf32, #tpu.memory_space<vmem>>, vector<8x4xf32>
    %cst = arith.constant dense<0.000000e+00> : vector<8x256xf32>
    %3 = tpu.matmul %2, %1, %cst {dimension_numbers = #tpu.dot_dimension_numbers<[1], [0], [0], [1], [0, 0, 1, 1], [], []>} : vector<8x4xf32>, vector<4x256xf32>, vector<8x256xf32> -> vector<8x256xf32>
    %cst_4 = arith.constant dense<0.000000e+00> : vector<8xf32>
    %4 = vector.multi_reduction <add>, %3, %cst_4 [1] : vector<8x256xf32> to vector<8xf32>
    %5 = vector.shape_cast %4 : vector<8xf32> to vector<8x1xf32>
    %6 = arith.mulf %3, %3 : vector<8x256xf32>
    %cst_5 = arith.constant dense<0.000000e+00> : vector<8xf32>
    %7 = vector.multi_reduction <add>, %6, %cst_5 [1] : vector<8x256xf32> to vector<8xf32>
    %8 = vector.shape_cast %7 : vector<8xf32> to vector<8x1xf32>
    %9 = vector.shape_cast %5 : vector<8x1xf32> to vector<1x1x8x1xf32>
    %c0_6 = arith.constant 0 : index
    %c0_7 = arith.constant 0 : index
    %c0_8 = arith.constant 0 : index
    %c0_9 = arith.constant 0 : index
    %10 = vector.load %arg4[%c0_6, %c0_7, %c0_8, %c0_9] : memref<1x1x8x1xf32, #tpu.memory_space<vmem>>, vector<1x1x8x1xf32>
    tpu.vector_store %arg4[%c0_6, %c0_7, %c0_8, %c0_9], %9 {strides = array<i32>} : memref<1x1x8x1xf32, #tpu.memory_space<vmem>>, vector<1x1x8x1xf32>,
    %11 = vector.shape_cast %8 : vector<8x1xf32> to vector<1x1x8x1xf32>
    %c0_10 = arith.constant 0 : index
    %c0_11 = arith.constant 0 : index
    %c0_12 = arith.constant 0 : index
    %c0_13 = arith.constant 0 : index
    %12 = vector.load %arg5[%c0_10, %c0_11, %c0_12, %c0_13] : memref<1x1x8x1xf32, #tpu.memory_space<vmem>>, vector<1x1x8x1xf32>
    tpu.vector_store %arg5[%c0_10, %c0_11, %c0_12, %c0_13], %11 {strides = array<i32>} : memref<1x1x8x1xf32, #tpu.memory_space<vmem>>, vector<1x1x8x1xf32>,
    return
  }
  func.func @transform_0(%arg0: i32, %arg1: i32) -> (i32, i32, i32) {
    %c0_i32 = arith.constant 0 : i32
    %c0_i32_0 = arith.constant 0 : i32
    return %arg0, %c0_i32, %arg1 : i32, i32, i32
  }
  func.func @transform_1(%arg0: i32, %arg1: i32) -> (i32, i32) {
    %c0_i32 = arith.constant 0 : i32
    %c0_i32_0 = arith.constant 0 : i32
    %c0_i32_1 = arith.constant 0 : i32
    return %c0_i32, %c0_i32_0 : i32, i32
  }
  func.func @transform_2(%arg0: i32, %arg1: i32) -> (i32, i32, i32, i32) {
    %c0_i32 = arith.constant 0 : i32
    %c0_i32_0 = arith.constant 0 : i32
    %c0_i32_1 = arith.constant 0 : i32
    return %arg0, %arg1, %c0_i32, %c0_i32_0 : i32, i32, i32, i32
  }
  func.func @transform_3(%arg0: i32, %arg1: i32) -> (i32, i32, i32, i32) {
    %c0_i32 = arith.constant 0 : i32
    %c0_i32_0 = arith.constant 0 : i32
    %c0_i32_1 = arith.constant 0 : i32
    return %arg0, %arg1, %c0_i32, %c0_i32_0 : i32, i32, i32, i32
  }
}

module attributes {stable_mosaic.version = 11 : i64} {
  func.func @conv_bn_relu_kernel(%arg0: i32, %arg1: i32, %arg2: memref<1x4x256xf32, #tpu.memory_space<vmem>>, %arg3: memref<8x4xf32, #tpu.memory_space<vmem>>, %arg4: memref<8x1xf32, #tpu.memory_space<vmem>>, %arg5: memref<8x1xf32, #tpu.memory_space<vmem>>, %arg6: memref<1x8x256xf32, #tpu.memory_space<vmem>>) attributes {dimension_semantics = [#tpu.dimension_semantics<parallel>, #tpu.dimension_semantics<parallel>], iteration_bounds = array<i64: 2, 1>, scalar_prefetch = 0 : i64, scratch_operands = 0 : i64, tpu.core_type = #tpu.core_type<tc>, window_params = [{transform_indices = @transform_0, window_bounds = array<i64: 1, 4, 256>}, {pipeline_mode = #tpu.pipeline_mode<synchronous>, transform_indices = @transform_1, window_bounds = array<i64: 8, 4>}, {pipeline_mode = #tpu.pipeline_mode<synchronous>, transform_indices = @transform_2, window_bounds = array<i64: 8, 1>}, {pipeline_mode = #tpu.pipeline_mode<synchronous>, transform_indices = @transform_3, window_bounds = array<i64: 8, 1>}, {transform_indices = @transform_4, window_bounds = array<i64: 1, 8, 256>}]} {
    %c0 = arith.constant 0 : index
    %c0_0 = arith.constant 0 : index
    %c0_1 = arith.constant 0 : index
    %0 = vector.load %arg2[%c0, %c0_0, %c0_1] : memref<1x4x256xf32, #tpu.memory_space<vmem>>, vector<1x4x256xf32>
    %1 = vector.shape_cast %0 : vector<1x4x256xf32> to vector<4x256xf32>
    %c0_2 = arith.constant 0 : index
    %c0_3 = arith.constant 0 : index
    %2 = vector.load %arg3[%c0_2, %c0_3] : memref<8x4xf32, #tpu.memory_space<vmem>>, vector<8x4xf32>
    %cst = arith.constant dense<0.000000e+00> : vector<8x256xf32>
    %3 = tpu.matmul %2, %1, %cst {dimension_numbers = #tpu.dot_dimension_numbers<[1], [0], [0], [1], [0, 0, 1, 1], [], []>} : vector<8x4xf32>, vector<4x256xf32>, vector<8x256xf32> -> vector<8x256xf32>
    %c0_4 = arith.constant 0 : index
    %c0_5 = arith.constant 0 : index
    %4 = vector.load %arg4[%c0_4, %c0_5] : memref<8x1xf32, #tpu.memory_space<vmem>>, vector<8x1xf32>
    %5 = vector.broadcast %4 : vector<8x1xf32> to vector<8x256xf32>
    %6 = arith.mulf %3, %5 : vector<8x256xf32>
    %c0_6 = arith.constant 0 : index
    %c0_7 = arith.constant 0 : index
    %7 = vector.load %arg5[%c0_6, %c0_7] : memref<8x1xf32, #tpu.memory_space<vmem>>, vector<8x1xf32>
    %8 = vector.broadcast %7 : vector<8x1xf32> to vector<8x256xf32>
    %9 = arith.addf %6, %8 : vector<8x256xf32>
    %cst_8 = arith.constant 0.000000e+00 : f32
    %10 = vector.broadcast %cst_8 : f32 to vector<8x256xf32>
    %11 = arith.maximumf %9, %10 : vector<8x256xf32>
    %c0_9 = arith.constant 0 : index
    %c0_10 = arith.constant 0 : index
    %c0_11 = arith.constant 0 : index
    %12 = vector.load %arg6[%c0_9, %c0_10, %c0_11] : memref<1x8x256xf32, #tpu.memory_space<vmem>>, vector<1x8x256xf32>
    %13 = vector.shape_cast %12 : vector<1x8x256xf32> to vector<8x256xf32>
    %14 = vector.shape_cast %11 : vector<8x256xf32> to vector<1x8x256xf32>
    tpu.vector_store %arg6[%c0_9, %c0_10, %c0_11], %14 {strides = array<i32>} : memref<1x8x256xf32, #tpu.memory_space<vmem>>, vector<1x8x256xf32>,
    return
  }
  func.func @transform_0(%arg0: i32, %arg1: i32) -> (i32, i32, i32) {
    %c0_i32 = arith.constant 0 : i32
    %c0_i32_0 = arith.constant 0 : i32
    return %arg0, %c0_i32, %arg1 : i32, i32, i32
  }
  func.func @transform_1(%arg0: i32, %arg1: i32) -> (i32, i32) {
    %c0_i32 = arith.constant 0 : i32
    %c0_i32_0 = arith.constant 0 : i32
    %c0_i32_1 = arith.constant 0 : i32
    return %c0_i32, %c0_i32_0 : i32, i32
  }
  func.func @transform_2(%arg0: i32, %arg1: i32) -> (i32, i32) {
    %c0_i32 = arith.constant 0 : i32
    %c0_i32_0 = arith.constant 0 : i32
    %c0_i32_1 = arith.constant 0 : i32
    return %c0_i32, %c0_i32_0 : i32, i32
  }
  func.func @transform_3(%arg0: i32, %arg1: i32) -> (i32, i32) {
    %c0_i32 = arith.constant 0 : i32
    %c0_i32_0 = arith.constant 0 : i32
    %c0_i32_1 = arith.constant 0 : i32
    return %c0_i32, %c0_i32_0 : i32, i32
  }
  func.func @transform_4(%arg0: i32, %arg1: i32) -> (i32, i32, i32) {
    %c0_i32 = arith.constant 0 : i32
    %c0_i32_0 = arith.constant 0 : i32
    return %arg0, %c0_i32, %arg1 : i32, i32, i32
  }
}

</mosaic_0001>

<bundles_post_ra>
// kernel: point_conv_forward.2
= control target key start
LH: loop header
LB: loop body
LE: loop exit
PB: predicated region body
PF: predicated region fallthrough
CT: control target
= control target key end

     0   :  { %s523_s12 = smov 0   ;;  %s525_s13 = smov 0   ;;  %s562_s0 = inlined_call_operand.vmem [shape: f32[2,4,256], index: 0, kind: input, shape index: {}]   ;;  %s563_s1 = inlined_call_operand.vmem [shape: f32[8,4], index: 1, kind: input, shape index: {}]   ;;  %s564_s2 = inlined_call_operand.vmem [shape: f32[2,1,8,1], index: 2, kind: output, shape index: {0}]   ;;  %s565_s3 = inlined_call_operand.vmem [shape: f32[2,1,8,1], index: 3, kind: output, shape index: {1}]  }
   0x1   :  { %s527_s14 = smov 0  }
   0x2 LB: > { %s26_s15 = sadd.s32 1, %s496_s13  ;;  %p441_p0 = scmp.ge.s32.totalorder %s500_s14, 1  ;;  %s500_s14 = sphi %s527_s14, %s14_s14   ;;  %s496_s13 = sphi %s525_s13, %s567_s13   ;;  %s492_s12 = sphi %s523_s12, %s566_s12  }
   0x3   : > { %p28_p1 = scmp.ge.s32.totalorder %s26_s15, 2  ;;  %p163_p2 = scmp.lt.s32.totalorder %s500_s14, 3 }
   0x5   : > { %s569_s15 = smov (%p28_p1, %s26_s15), 0  ;;  %p164_p3 = pnand %p441_p0, %p163_p2 }
   0x6   : > { %p201_p4 = scmp.lt.s32.totalorder (!%p164_p3), %s492_s12, 1 }
   0x7   : > { %167 = sbr.rel (%p164_p3) target bundleno = 360 (0x168), region = 28 }
   0xc   : > { %v502_v0 = vmov 0.0   ;;  %s571_s12 = smov (!%p201_p4, %s492_s12), 1  ;;  %vm232_vm0 = vcmask 1043456   ;;  %v225_v3 = vld [vmem:[%s563_s1] sm:$0xff]  ;;  %vm228_vm1 = vcmask 31744   ;;  %vm316_vm2 = vcmask 7168  }
   0xd   : > { %301 = vmatprep.mubr.f32.mxu0 %v502_v0  ;;  %s451_s16 = sshll.u32 %s571_s12, 3 }
   0xe   : > { %s208_s19 = scalar_lea.vmem %s562_s0, %s451_s16  ;;  %s216_s24 = scalar_lea.vmem %s564_s2, %s451_s16 }
   0xf   : > { %v224_v1 = vld [vmem:[%s208_s19] sm:$0xff]  ;;  %s223_s27 = scalar_lea.vmem %s565_s3, %s451_s16 }
  0x10   : > { %v227_v2 = vcombine.high %v224_v1, %v224_v1 }
  0x12   : > { %446 = vmatprep.subr.msk.mxu0 %vm232_vm0, %v227_v2 }
  0x13   : > { %447 = vmatpush1.msk.msra.mxu0 %vm232_vm0, %v224_v1 }
  0x14   : > { %448 = vmatmul.mubr.msk.f32.vlgmr.msra.gmra.mxu0 %vm228_vm1, %v225_v3 }
  0xd4   : > { %v303_v4 = vpop.f32.mrf.mxu0 }
  0xd5   : > { %v311_v8 = vmul.f32 %v303_v4, %v303_v4 }
  0xd6   : > { %v305_v5 = vpop.f32.mrf.mxu0 }
  0xd7   : > { %v312_v6 = vmul.f32 %v305_v5, %v305_v5  ;;  %v308_v7 = vadd.f32 %v305_v5, %v303_v4 }
  0xd9   : > { %309 = vadd.xlane.f32.xlu0 %v308_v7  ;;  %v313_v9 = vadd.f32 %v312_v6, %v311_v8 }
  0xdd   : > { %314 = vadd.xlane.f32.xlu0 %v313_v9 }
 0x162   : > { %v310_v10 = vpop.xlane.xlu0 %309 }
 0x163   : > { %317 = vst.msk [vmem:[%s216_s24] sm:$0xff] %vm316_vm2, %v310_v10 }
 0x166   : > { %v315_v11 = vpop.xlane.xlu0 %314 }
 0x167   : > { %318 = vst.msk [vmem:[%s223_s27] sm:$0xff] %vm316_vm2, %v315_v11 }
 0x168 PF: > { %s14_s14 = sadd.s32 1, %s500_s14   ;;  %s566_s12 = smov %s496_s13 }
 0x169   : > { %p11_p5 = scmp.ge.s32.totalorder %s14_s14, 4   ;;  %s567_s13 = smov %s569_s15 }
 0x16b   :  { %13 = sbr.rel (!%p11_p5) target bundleno = 2 (0x2), region = 70 }

// kernel: point_conv_forward.3
= control target key start
LH: loop header
LB: loop body
LE: loop exit
PB: predicated region body
PF: predicated region fallthrough
CT: control target
= control target key end

     0   :  { %s523_s15 = smov 0   ;;  %s525_s16 = smov 0   ;;  %s565_s0 = inlined_call_operand.vmem [shape: f32[2,4,256], index: 0, kind: input, shape index: {}]   ;;  %s566_s1 = inlined_call_operand.vmem [shape: f32[8,4], index: 1, kind: input, shape index: {}]   ;;  %s567_s2 = inlined_call_operand.vmem [shape: f32[8,1], index: 2, kind: input, shape index: {}]   ;;  %s568_s3 = inlined_call_operand.vmem [shape: f32[8,1], index: 3, kind: input, shape index: {}]   ;;  %s569_s4 = inlined_call_operand.vmem [shape: f32[2,8,256], index: 4, kind: output, shape index: {}]  }
   0x1   :  { %s527_s17 = smov 0  }
   0x2 LB: > { %s26_s18 = sadd.s32 1, %s490_s16  ;;  %p432_p0 = scmp.ge.s32.totalorder %s494_s17, 1  ;;  %s494_s17 = sphi %s527_s17, %s14_s17   ;;  %s490_s16 = sphi %s525_s16, %s571_s16   ;;  %s486_s15 = sphi %s523_s15, %s570_s15  }
   0x3   : > { %p28_p1 = scmp.ge.s32.totalorder %s26_s18, 2  ;;  %p183_p2 = scmp.lt.s32.totalorder %s494_s17, 3 }
   0x5   : > { %s573_s18 = smov (%p28_p1, %s26_s18), 0  ;;  %p184_p3 = pnand %p432_p0, %p183_p2 }
   0x6   : > { %p218_p4 = scmp.lt.s32.totalorder (!%p184_p3), %s486_s15, 1 }
   0x7   : > { %187 = sbr.rel (%p184_p3) target bundleno = 222 (0xde), region = 36 }
   0xc   : > { %v496_v0 = vmov 0.0   ;;  %v497_v1 = vmov 0   ;;  %v321_v2 = vld [vmem:[%s567_s2] sm:$0xff]  ;;  %s575_s15 = smov (!%p218_p4, %s486_s15), 1  ;;  %vm245_vm0 = vcmask 1043456   ;;  %vm241_vm1 = vcmask 31744  }
   0xd   : > { %314 = vmatprep.mubr.f32.mxu0 %v496_v0  ;;  %470 = vset.pattern.permute.xlu0 %v497_v1  ;;  %v329_v3 = vld [vmem:[%s568_s3] sm:$0xff]  ;;  %s442_s23 = sshll.u32 %s575_s15, 3  ;;  %s443_s29 = sshll.u32 %s575_s15, 4 }
   0xe   : > { %324 = vperm.xlu0 %470, %v321_v2   ;;  %s225_s26 = scalar_lea.vmem %s565_s0, %s442_s23  ;;  %v238_v6 = vld [vmem:[%s566_s1] sm:$0xff]  ;;  %s235_s6 = scalar_lea.vmem %s569_s4, %s443_s29 }
   0xf   : > { %v237_v4 = vld [vmem:[%s225_s26] sm:$0xff] }
  0x10   : > { %v240_v5 = vcombine.high %v237_v4, %v237_v4 }
  0x12   : > { %332 = vperm.xlu0 %470, %v329_v3   ;;  %437 = vmatprep.subr.msk.mxu0 %vm245_vm0, %v240_v5 }
  0x13   : > { %438 = vmatpush1.msk.msra.mxu0 %vm245_vm0, %v237_v4 }
  0x14   : > { %439 = vmatmul.mubr.msk.f32.vlgmr.msra.gmra.mxu0 %vm241_vm1, %v238_v6 }
  0x89   : > { %v325_v7 = vpop.permute.xlu0 %324 }
  0x8d   : > { %v333_v10 = vpop.permute.xlu0 %332 }
  0xd4   : > { %v316_v8 = vpop.f32.mrf.mxu0 }
  0xd5   : > { %v327_v9 = vmul.f32 %v325_v7, %v316_v8 }
  0xd6   : > { %v318_v11 = vpop.f32.mrf.mxu0 }
  0xd7   : > { %v335_v12 = vadd.f32 %v333_v10, %v327_v9  ;;  %v328_v13 = vmul.f32 %v325_v7, %v318_v11 }
  0xd9   : > { %v337_v14 = vmax.f32 %v335_v12, 0.0  ;;  %v336_v15 = vadd.f32 %v333_v10, %v328_v13 }
  0xdb   : > { %339 = vst [vmem:[%s235_s6] sm:$0xff] %v337_v14  ;;  %v338_v16 = vmax.f32 %v336_v15, 0.0 }
  0xdd   : > { %340 = vst [vmem:[%s235_s6 + $0x8] sm:$0xff] %v338_v16 }
  0xde PF: > { %s14_s17 = sadd.s32 1, %s494_s17   ;;  %s570_s15 = smov %s490_s16 }
  0xdf   : > { %p11_p5 = scmp.ge.s32.totalorder %s14_s17, 4   ;;  %s571_s16 = smov %s573_s18 }
  0xe1   :  { %13 = sbr.rel (!%p11_p5) target bundleno = 2 (0x2), region = 66 }

</bundles_post_ra>
